<compile_context>
chip_gen: v7x
topology: tpu7x:2x2x1
jax: 0.10.0
libtpu: 0.0.40
codegen_flags: <defaults>
</compile_context>

<pallas_src>
import jax
import jax.numpy as jnp
from jax import lax
from jax.experimental import pallas as pl
from jax.experimental.pallas import tpu as pltpu


def _round_up(x, m):
    return (x + m - 1) // m * m


# ---------------------------------------------------------------------------
# Kernels
# ---------------------------------------------------------------------------
def _gather_add_kernel(ids_ref, pos_ref, tok_tab_ref, pos_tab_ref, out_ref):
    """One grid step = one tile of T tokens.

    ids_ref / pos_ref : SMEM (padded_tokens,) int32   (scalar prefetch)
    tok_tab_ref       : VMEM (V, D) f32   (resident, constant block)
    pos_tab_ref       : VMEM (L, D) f32   (resident, constant block)
    out_ref           : VMEM (T, D) f32   output tile
    """
    tile_tokens = out_ref.shape[0]
    t0 = pl.program_id(0) * tile_tokens
    vocab = tok_tab_ref.shape[0]
    max_len = pos_tab_ref.shape[0]

    def body(t, carry):
        # Scalar-unit reads of the prefetched ids.
        tok_id = ids_ref[t0 + t]
        pos_id = pos_ref[t0 + t]
        # Clamp so a bad id can never read outside the VMEM allocation
        # (nn.Embedding would raise; we clamp instead of faulting).
        tok_id = jnp.clip(tok_id, 0, vocab - 1)
        pos_id = jnp.clip(pos_id, 0, max_len - 1)
        row = tok_tab_ref[pl.ds(tok_id, 1), :] + pos_tab_ref[pl.ds(pos_id, 1), :]
        out_ref[pl.ds(t, 1), :] = row
        return carry

    lax.fori_loop(0, tile_tokens, body, 0, unroll=tile_tokens <= 64)


def _gather_kernel(ids_ref, tok_tab_ref, out_ref):
    """Token-embedding-only variant (use_pos_embed=False)."""
    tile_tokens = out_ref.shape[0]
    t0 = pl.program_id(0) * tile_tokens
    vocab = tok_tab_ref.shape[0]

    def body(t, carry):
        tok_id = jnp.clip(ids_ref[t0 + t], 0, vocab - 1)
        out_ref[pl.ds(t, 1), :] = tok_tab_ref[pl.ds(tok_id, 1), :]
        return carry

    lax.fori_loop(0, tile_tokens, body, 0, unroll=tile_tokens <= 64)


# ---------------------------------------------------------------------------
# Wrapper
# ---------------------------------------------------------------------------
def input_adapter_forward(sequence, positions, tok_table, pos_table=None,
                          tile_tokens=256):
    B, N = sequence.shape
    V, D = tok_table.shape
    num_tokens = B * N

    ids = sequence.reshape(num_tokens).astype(jnp.int32)

    # Token-tile size: sublane-aligned rows, full (lane-dense) D per row.
    if num_tokens <= tile_tokens:
        T = _round_up(num_tokens, 8)
    else:
        T = tile_tokens
    padded = _round_up(num_tokens, T)
    if padded != num_tokens:
        ids = jnp.pad(ids, (0, padded - num_tokens))
    grid = (padded // T,)

    if pos_table is not None:
        L, _ = pos_table.shape
        pos = positions.reshape(num_tokens).astype(jnp.int32)
        if padded != num_tokens:
            pos = jnp.pad(pos, (0, padded - num_tokens))

        vmem_bytes = 4 * (2 * V * D + 2 * L * D + 4 * T * D) + (1 << 20)
        out = pl.pallas_call(
            _gather_add_kernel,
            out_shape=jax.ShapeDtypeStruct((padded, D), jnp.float32),
            grid_spec=pltpu.PrefetchScalarGridSpec(
                num_scalar_prefetch=2,                 # ids, positions -> SMEM
                grid=grid,
                in_specs=[
                    pl.BlockSpec((V, D), lambda i, ids_r, pos_r: (0, 0)),
                    pl.BlockSpec((L, D), lambda i, ids_r, pos_r: (0, 0)),
                ],
                out_specs=pl.BlockSpec((T, D), lambda i, ids_r, pos_r: (i, 0)),
            ),
            compiler_params=pltpu.CompilerParams(
                dimension_semantics=("parallel",),
                vmem_limit_bytes=int(min(max(vmem_bytes, 4 << 20), 64 << 20)),
            ),
        )(ids, pos, tok_table, pos_table)
    else:
        vmem_bytes = 4 * (2 * V * D + 4 * T * D) + (1 << 20)
        out = pl.pallas_call(
            _gather_kernel,
            out_shape=jax.ShapeDtypeStruct((padded, D), jnp.float32),
            grid_spec=pltpu.PrefetchScalarGridSpec(
                num_scalar_prefetch=1,                 # ids -> SMEM
                grid=grid,
                in_specs=[
                    pl.BlockSpec((V, D), lambda i, ids_r: (0, 0)),
                ],
                out_specs=pl.BlockSpec((T, D), lambda i, ids_r: (i, 0)),
            ),
            compiler_params=pltpu.CompilerParams(
                dimension_semantics=("parallel",),
                vmem_limit_bytes=int(min(max(vmem_bytes, 4 << 20), 64 << 20)),
            ),
        )(ids, tok_table)

    return out[:num_tokens].reshape(B, N, D)


class InputAdapterJax:
    """Deterministic-parameter equivalent of smiles_cl.modules.InputAdapter."""

    def __init__(self, dim, vocab_size, pad_idx=None, max_len=1024,
                 use_pos_embed=True, key=None):
        if key is None:
            key = jax.random.PRNGKey(0)
        k_tok, k_pos = jax.random.split(key)
        # nn.Embedding default init: N(0, 1)
        tok = jax.random.normal(k_tok, (vocab_size, dim), dtype=jnp.float32)
        if pad_idx is not None:
            tok = tok.at[pad_idx].set(0.0)   # padding_idx row is zeros
        self.tok_table = tok
        self.max_len = max_len
        if use_pos_embed:
            self.pos_table = jax.random.normal(k_pos, (max_len, dim),
                                               dtype=jnp.float32)
        else:
            self.pos_table = None

    def __call__(self, sequence, positions=None):
        B, N = sequence.shape
        if self.pos_table is not None and positions is None:
            positions = jnp.broadcast_to(
                jnp.arange(N, dtype=jnp.int32)[None, :], (B, N))
        if positions is not None:
            positions = positions.astype(jnp.int32)
        return input_adapter_forward(sequence.astype(jnp.int32), positions,
                                     self.tok_table, self.pos_table)


if __name__ == "__main__":
    key = jax.random.PRNGKey(0)
    k_param, k_seq = jax.random.split(key)

    dim, vocab_size, max_len = 32, 32, 16
    B, N = 2, 8
    pad_idx = 0

    adapter = InputAdapterJax(dim=dim, vocab_size=vocab_size, pad_idx=pad_idx,
                              max_len=max_len, use_pos_embed=True, key=k_param)

    sequence = jax.random.randint(k_seq, (B, N), 0, vocab_size, dtype=jnp.int32)

    out = adapter(sequence)
    out = jax.block_until_ready(out)

    # Reference in plain JAX (gather-based).
    positions = jnp.broadcast_to(jnp.arange(N, dtype=jnp.int32)[None, :], (B, N))
    ref = adapter.tok_table[sequence] + adapter.pos_table[positions]
    assert out.shape == (B, N, dim)
    assert jnp.allclose(out, ref, atol=1e-5), "mismatch vs reference (with pos)"

    # Also exercise the use_pos_embed=False path (no zero-table waste).
    adapter_np = InputAdapterJax(dim=dim, vocab_size=vocab_size, pad_idx=pad_idx,
                                 max_len=max_len, use_pos_embed=False, key=k_param)
    out_np = jax.block_until_ready(adapter_np(sequence))
    ref_np = adapter_np.tok_table[sequence]
    assert jnp.allclose(out_np, ref_np, atol=1e-5), "mismatch vs reference (no pos)"

    print("KERNEL_OK")
</pallas_src>

<mosaic_0001>
module attributes {stable_mosaic.version = 11 : i64} {
  func.func @_gather_add_kernel(%arg0: i32, %arg1: memref<16xi32, #tpu.memory_space<smem>>, %arg2: memref<16xi32, #tpu.memory_space<smem>>, %arg3: memref<32x32xf32, #tpu.memory_space<vmem>>, %arg4: memref<16x32xf32, #tpu.memory_space<vmem>>, %arg5: memref<16x32xf32, #tpu.memory_space<vmem>>) attributes {dimension_semantics = [#tpu.dimension_semantics<parallel>], iteration_bounds = array<i64: 1>, scalar_prefetch = 2 : i64, scratch_operands = 0 : i64, tpu.core_type = #tpu.core_type<tc>, window_params = [{pipeline_mode = #tpu.pipeline_mode<synchronous>, transform_indices = @transform_0, window_bounds = array<i64: 32, 32>}, {pipeline_mode = #tpu.pipeline_mode<synchronous>, transform_indices = @transform_1, window_bounds = array<i64: 16, 32>}, {transform_indices = @transform_2, window_bounds = array<i64: 16, 32>}]} {
    %c16_i32 = arith.constant 16 : i32
    %0 = arith.muli %arg0, %c16_i32 : i32
    %c0_i32 = arith.constant 0 : i32
    %1 = arith.addi %0, %c0_i32 : i32
    %2 = arith.index_cast %1 : i32 to index
    %3 = memref.load %arg1[%2] : memref<16xi32, #tpu.memory_space<smem>>
    %4 = arith.addi %0, %c0_i32 : i32
    %5 = arith.index_cast %4 : i32 to index
    %6 = memref.load %arg2[%5] : memref<16xi32, #tpu.memory_space<smem>>
    %c0_i32_0 = arith.constant 0 : i32
    %c31_i32 = arith.constant 31 : i32
    %7 = arith.maxsi %c0_i32_0, %3 : i32
    %8 = arith.minsi %c31_i32, %7 : i32
    %c0_i32_1 = arith.constant 0 : i32
    %c15_i32 = arith.constant 15 : i32
    %9 = arith.maxsi %c0_i32_1, %6 : i32
    %10 = arith.minsi %c15_i32, %9 : i32
    %11 = arith.index_cast %8 : i32 to index
    %c0 = arith.constant 0 : index
    %12 = vector.load %arg3[%11, %c0] : memref<32x32xf32, #tpu.memory_space<vmem>>, vector<1x32xf32>
    %13 = arith.index_cast %10 : i32 to index
    %c0_2 = arith.constant 0 : index
    %14 = vector.load %arg4[%13, %c0_2] : memref<16x32xf32, #tpu.memory_space<vmem>>, vector<1x32xf32>
    %15 = arith.addf %12, %14 : vector<1x32xf32>
    %16 = arith.index_cast %c0_i32 : i32 to index
    %c0_3 = arith.constant 0 : index
    %17 = vector.load %arg5[%16, %c0_3] : memref<16x32xf32, #tpu.memory_space<vmem>>, vector<1x32xf32>
    tpu.vector_store %arg5[%16, %c0_3], %15 {strides = array<i32>} : memref<16x32xf32, #tpu.memory_space<vmem>>, vector<1x32xf32>,
    %c1_i32 = arith.constant 1 : i32
    %18 = arith.addi %0, %c1_i32 : i32
    %19 = arith.index_cast %18 : i32 to index
    %20 = memref.load %arg1[%19] : memref<16xi32, #tpu.memory_space<smem>>
    %21 = arith.addi %0, %c1_i32 : i32
    %22 = arith.index_cast %21 : i32 to index
    %23 = memref.load %arg2[%22] : memref<16xi32, #tpu.memory_space<smem>>
    %c0_i32_4 = arith.constant 0 : i32
    %c31_i32_5 = arith.constant 31 : i32
    %24 = arith.maxsi %c0_i32_4, %20 : i32
    %25 = arith.minsi %c31_i32_5, %24 : i32
    %c0_i32_6 = arith.constant 0 : i32
    %c15_i32_7 = arith.constant 15 : i32
    %26 = arith.maxsi %c0_i32_6, %23 : i32
    %27 = arith.minsi %c15_i32_7, %26 : i32
    %28 = arith.index_cast %25 : i32 to index
    %c0_8 = arith.constant 0 : index
    %29 = vector.load %arg3[%28, %c0_8] : memref<32x32xf32, #tpu.memory_space<vmem>>, vector<1x32xf32>
    %30 = arith.index_cast %27 : i32 to index
    %c0_9 = arith.constant 0 : index
    %31 = vector.load %arg4[%30, %c0_9] : memref<16x32xf32, #tpu.memory_space<vmem>>, vector<1x32xf32>
    %32 = arith.addf %29, %31 : vector<1x32xf32>
    %33 = arith.index_cast %c1_i32 : i32 to index
    %c0_10 = arith.constant 0 : index
    %34 = vector.load %arg5[%33, %c0_10] : memref<16x32xf32, #tpu.memory_space<vmem>>, vector<1x32xf32>
    tpu.vector_store %arg5[%33, %c0_10], %32 {strides = array<i32>} : memref<16x32xf32, #tpu.memory_space<vmem>>, vector<1x32xf32>,
    %c2_i32 = arith.constant 2 : i32
    %35 = arith.addi %0, %c2_i32 : i32
    %36 = arith.index_cast %35 : i32 to index
    %37 = memref.load %arg1[%36] : memref<16xi32, #tpu.memory_space<smem>>
    %38 = arith.addi %0, %c2_i32 : i32
    %39 = arith.index_cast %38 : i32 to index
    %40 = memref.load %arg2[%39] : memref<16xi32, #tpu.memory_space<smem>>
    %c0_i32_11 = arith.constant 0 : i32
    %c31_i32_12 = arith.constant 31 : i32
    %41 = arith.maxsi %c0_i32_11, %37 : i32
    %42 = arith.minsi %c31_i32_12, %41 : i32
    %c0_i32_13 = arith.constant 0 : i32
    %c15_i32_14 = arith.constant 15 : i32
    %43 = arith.maxsi %c0_i32_13, %40 : i32
    %44 = arith.minsi %c15_i32_14, %43 : i32
    %45 = arith.index_cast %42 : i32 to index
    %c0_15 = arith.constant 0 : index
    %46 = vector.load %arg3[%45, %c0_15] : memref<32x32xf32, #tpu.memory_space<vmem>>, vector<1x32xf32>
    %47 = arith.index_cast %44 : i32 to index
    %c0_16 = arith.constant 0 : index
    %48 = vector.load %arg4[%47, %c0_16] : memref<16x32xf32, #tpu.memory_space<vmem>>, vector<1x32xf32>
    %49 = arith.addf %46, %48 : vector<1x32xf32>
    %50 = arith.index_cast %c2_i32 : i32 to index
    %c0_17 = arith.constant 0 : index
    %51 = vector.load %arg5[%50, %c0_17] : memref<16x32xf32, #tpu.memory_space<vmem>>, vector<1x32xf32>
    tpu.vector_store %arg5[%50, %c0_17], %49 {strides = array<i32>} : memref<16x32xf32, #tpu.memory_space<vmem>>, vector<1x32xf32>,
    %c3_i32 = arith.constant 3 : i32
    %52 = arith.addi %0, %c3_i32 : i32
    %53 = arith.index_cast %52 : i32 to index
    %54 = memref.load %arg1[%53] : memref<16xi32, #tpu.memory_space<smem>>
    %55 = arith.addi %0, %c3_i32 : i32
    %56 = arith.index_cast %55 : i32 to index
    %57 = memref.load %arg2[%56] : memref<16xi32, #tpu.memory_space<smem>>
    %c0_i32_18 = arith.constant 0 : i32
    %c31_i32_19 = arith.constant 31 : i32
    %58 = arith.maxsi %c0_i32_18, %54 : i32
    %59 = arith.minsi %c31_i32_19, %58 : i32
    %c0_i32_20 = arith.constant 0 : i32
    %c15_i32_21 = arith.constant 15 : i32
    %60 = arith.maxsi %c0_i32_20, %57 : i32
    %61 = arith.minsi %c15_i32_21, %60 : i32
    %62 = arith.index_cast %59 : i32 to index
    %c0_22 = arith.constant 0 : index
    %63 = vector.load %arg3[%62, %c0_22] : memref<32x32xf32, #tpu.memory_space<vmem>>, vector<1x32xf32>
    %64 = arith.index_cast %61 : i32 to index
    %c0_23 = arith.constant 0 : index
    %65 = vector.load %arg4[%64, %c0_23] : memref<16x32xf32, #tpu.memory_space<vmem>>, vector<1x32xf32>
    %66 = arith.addf %63, %65 : vector<1x32xf32>
    %67 = arith.index_cast %c3_i32 : i32 to index
    %c0_24 = arith.constant 0 : index
    %68 = vector.load %arg5[%67, %c0_24] : memref<16x32xf32, #tpu.memory_space<vmem>>, vector<1x32xf32>
    tpu.vector_store %arg5[%67, %c0_24], %66 {strides = array<i32>} : memref<16x32xf32, #tpu.memory_space<vmem>>, vector<1x32xf32>,
    %c4_i32 = arith.constant 4 : i32
    %69 = arith.addi %0, %c4_i32 : i32
    %70 = arith.index_cast %69 : i32 to index
    %71 = memref.load %arg1[%70] : memref<16xi32, #tpu.memory_space<smem>>
    %72 = arith.addi %0, %c4_i32 : i32
    %73 = arith.index_cast %72 : i32 to index
    %74 = memref.load %arg2[%73] : memref<16xi32, #tpu.memory_space<smem>>
    %c0_i32_25 = arith.constant 0 : i32
    %c31_i32_26 = arith.constant 31 : i32
    %75 = arith.maxsi %c0_i32_25, %71 : i32
    %76 = arith.minsi %c31_i32_26, %75 : i32
    %c0_i32_27 = arith.constant 0 : i32
    %c15_i32_28 = arith.constant 15 : i32
    %77 = arith.maxsi %c0_i32_27, %74 : i32
    %78 = arith.minsi %c15_i32_28, %77 : i32
    %79 = arith.index_cast %76 : i32 to index
    %c0_29 = arith.constant 0 : index
    %80 = vector.load %arg3[%79, %c0_29] : memref<32x32xf32, #tpu.memory_space<vmem>>, vector<1x32xf32>
    %81 = arith.index_cast %78 : i32 to index
    %c0_30 = arith.constant 0 : index
    %82 = vector.load %arg4[%81, %c0_30] : memref<16x32xf32, #tpu.memory_space<vmem>>, vector<1x32xf32>
    %83 = arith.addf %80, %82 : vector<1x32xf32>
    %84 = arith.index_cast %c4_i32 : i32 to index
    %c0_31 = arith.constant 0 : index
    %85 = vector.load %arg5[%84, %c0_31] : memref<16x32xf32, #tpu.memory_space<vmem>>, vector<1x32xf32>
    tpu.vector_store %arg5[%84, %c0_31], %83 {strides = array<i32>} : memref<16x32xf32, #tpu.memory_space<vmem>>, vector<1x32xf32>,
    %c5_i32 = arith.constant 5 : i32
    %86 = arith.addi %0, %c5_i32 : i32
    %87 = arith.index_cast %86 : i32 to index
    %88 = memref.load %arg1[%87] : memref<16xi32, #tpu.memory_space<smem>>
    %89 = arith.addi %0, %c5_i32 : i32
    %90 = arith.index_cast %89 : i32 to index
    %91 = memref.load %arg2[%90] : memref<16xi32, #tpu.memory_space<smem>>
    %c0_i32_32 = arith.constant 0 : i32
    %c31_i32_33 = arith.constant 31 : i32
    %92 = arith.maxsi %c0_i32_32, %88 : i32
    %93 = arith.minsi %c31_i32_33, %92 : i32
    %c0_i32_34 = arith.constant 0 : i32
    %c15_i32_35 = arith.constant 15 : i32
    %94 = arith.maxsi %c0_i32_34, %91 : i32
    %95 = arith.minsi %c15_i32_35, %94 : i32
    %96 = arith.index_cast %93 : i32 to index
    %c0_36 = arith.constant 0 : index
    %97 = vector.load %arg3[%96, %c0_36] : memref<32x32xf32, #tpu.memory_space<vmem>>, vector<1x32xf32>
    %98 = arith.index_cast %95 : i32 to index
    %c0_37 = arith.constant 0 : index
    %99 = vector.load %arg4[%98, %c0_37] : memref<16x32xf32, #tpu.memory_space<vmem>>, vector<1x32xf32>
    %100 = arith.addf %97, %99 : vector<1x32xf32>
    %101 = arith.index_cast %c5_i32 : i32 to index
    %c0_38 = arith.constant 0 : index
    %102 = vector.load %arg5[%101, %c0_38] : memref<16x32xf32, #tpu.memory_space<vmem>>, vector<1x32xf32>
    tpu.vector_store %arg5[%101, %c0_38], %100 {strides = array<i32>} : memref<16x32xf32, #tpu.memory_space<vmem>>, vector<1x32xf32>,
    %c6_i32 = arith.constant 6 : i32
    %103 = arith.addi %0, %c6_i32 : i32
    %104 = arith.index_cast %103 : i32 to index
    %105 = memref.load %arg1[%104] : memref<16xi32, #tpu.memory_space<smem>>
    %106 = arith.addi %0, %c6_i32 : i32
    %107 = arith.index_cast %106 : i32 to index
    %108 = memref.load %arg2[%107] : memref<16xi32, #tpu.memory_space<smem>>
    %c0_i32_39 = arith.constant 0 : i32
    %c31_i32_40 = arith.constant 31 : i32
    %109 = arith.maxsi %c0_i32_39, %105 : i32
    %110 = arith.minsi %c31_i32_40, %109 : i32
    %c0_i32_41 = arith.constant 0 : i32
    %c15_i32_42 = arith.constant 15 : i32
    %111 = arith.maxsi %c0_i32_41, %108 : i32
    %112 = arith.minsi %c15_i32_42, %111 : i32
    %113 = arith.index_cast %110 : i32 to index
    %c0_43 = arith.constant 0 : index
    %114 = vector.load %arg3[%113, %c0_43] : memref<32x32xf32, #tpu.memory_space<vmem>>, vector<1x32xf32>
    %115 = arith.index_cast %112 : i32 to index
    %c0_44 = arith.constant 0 : index
    %116 = vector.load %arg4[%115, %c0_44] : memref<16x32xf32, #tpu.memory_space<vmem>>, vector<1x32xf32>
    %117 = arith.addf %114, %116 : vector<1x32xf32>
    %118 = arith.index_cast %c6_i32 : i32 to index
    %c0_45 = arith.constant 0 : index
    %119 = vector.load %arg5[%118, %c0_45] : memref<16x32xf32, #tpu.memory_space<vmem>>, vector<1x32xf32>
    tpu.vector_store %arg5[%118, %c0_45], %117 {strides = array<i32>} : memref<16x32xf32, #tpu.memory_space<vmem>>, vector<1x32xf32>,
    %c7_i32 = arith.constant 7 : i32
    %120 = arith.addi %0, %c7_i32 : i32
    %121 = arith.index_cast %120 : i32 to index
    %122 = memref.load %arg1[%121] : memref<16xi32, #tpu.memory_space<smem>>
    %123 = arith.addi %0, %c7_i32 : i32
    %124 = arith.index_cast %123 : i32 to index
    %125 = memref.load %arg2[%124] : memref<16xi32, #tpu.memory_space<smem>>
    %c0_i32_46 = arith.constant 0 : i32
    %c31_i32_47 = arith.constant 31 : i32
    %126 = arith.maxsi %c0_i32_46, %122 : i32
    %127 = arith.minsi %c31_i32_47, %126 : i32
    %c0_i32_48 = arith.constant 0 : i32
    %c15_i32_49 = arith.constant 15 : i32
    %128 = arith.maxsi %c0_i32_48, %125 : i32
    %129 = arith.minsi %c15_i32_49, %128 : i32
    %130 = arith.index_cast %127 : i32 to index
    %c0_50 = arith.constant 0 : index
    %131 = vector.load %arg3[%130, %c0_50] : memref<32x32xf32, #tpu.memory_space<vmem>>, vector<1x32xf32>
    %132 = arith.index_cast %129 : i32 to index
    %c0_51 = arith.constant 0 : index
    %133 = vector.load %arg4[%132, %c0_51] : memref<16x32xf32, #tpu.memory_space<vmem>>, vector<1x32xf32>
    %134 = arith.addf %131, %133 : vector<1x32xf32>
    %135 = arith.index_cast %c7_i32 : i32 to index
    %c0_52 = arith.constant 0 : index
    %136 = vector.load %arg5[%135, %c0_52] : memref<16x32xf32, #tpu.memory_space<vmem>>, vector<1x32xf32>
    tpu.vector_store %arg5[%135, %c0_52], %134 {strides = array<i32>} : memref<16x32xf32, #tpu.memory_space<vmem>>, vector<1x32xf32>,
    %c8_i32 = arith.constant 8 : i32
    %137 = arith.addi %0, %c8_i32 : i32
    %138 = arith.index_cast %137 : i32 to index
    %139 = memref.load %arg1[%138] : memref<16xi32, #tpu.memory_space<smem>>
    %140 = arith.addi %0, %c8_i32 : i32
    %141 = arith.index_cast %140 : i32 to index
    %142 = memref.load %arg2[%141] : memref<16xi32, #tpu.memory_space<smem>>
    %c0_i32_53 = arith.constant 0 : i32
    %c31_i32_54 = arith.constant 31 : i32
    %143 = arith.maxsi %c0_i32_53, %139 : i32
    %144 = arith.minsi %c31_i32_54, %143 : i32
    %c0_i32_55 = arith.constant 0 : i32
    %c15_i32_56 = arith.constant 15 : i32
    %145 = arith.maxsi %c0_i32_55, %142 : i32
    %146 = arith.minsi %c15_i32_56, %145 : i32
    %147 = arith.index_cast %144 : i32 to index
    %c0_57 = arith.constant 0 : index
    %148 = vector.load %arg3[%147, %c0_57] : memref<32x32xf32, #tpu.memory_space<vmem>>, vector<1x32xf32>
    %149 = arith.index_cast %146 : i32 to index
    %c0_58 = arith.constant 0 : index
    %150 = vector.load %arg4[%149, %c0_58] : memref<16x32xf32, #tpu.memory_space<vmem>>, vector<1x32xf32>
    %151 = arith.addf %148, %150 : vector<1x32xf32>
    %152 = arith.index_cast %c8_i32 : i32 to index
    %c0_59 = arith.constant 0 : index
    %153 = vector.load %arg5[%152, %c0_59] : memref<16x32xf32, #tpu.memory_space<vmem>>, vector<1x32xf32>
    tpu.vector_store %arg5[%152, %c0_59], %151 {strides = array<i32>} : memref<16x32xf32, #tpu.memory_space<vmem>>, vector<1x32xf32>,
    %c9_i32 = arith.constant 9 : i32
    %154 = arith.addi %0, %c9_i32 : i32
    %155 = arith.index_cast %154 : i32 to index
    %156 = memref.load %arg1[%155] : memref<16xi32, #tpu.memory_space<smem>>
    %157 = arith.addi %0, %c9_i32 : i32
    %158 = arith.index_cast %157 : i32 to index
    %159 = memref.load %arg2[%158] : memref<16xi32, #tpu.memory_space<smem>>
    %c0_i32_60 = arith.constant 0 : i32
    %c31_i32_61 = arith.constant 31 : i32
    %160 = arith.maxsi %c0_i32_60, %156 : i32
    %161 = arith.minsi %c31_i32_61, %160 : i32
    %c0_i32_62 = arith.constant 0 : i32
    %c15_i32_63 = arith.constant 15 : i32
    %162 = arith.maxsi %c0_i32_62, %159 : i32
    %163 = arith.minsi %c15_i32_63, %162 : i32
    %164 = arith.index_cast %161 : i32 to index
    %c0_64 = arith.constant 0 : index
    %165 = vector.load %arg3[%164, %c0_64] : memref<32x32xf32, #tpu.memory_space<vmem>>, vector<1x32xf32>
    %166 = arith.index_cast %163 : i32 to index
    %c0_65 = arith.constant 0 : index
    %167 = vector.load %arg4[%166, %c0_65] : memref<16x32xf32, #tpu.memory_space<vmem>>, vector<1x32xf32>
    %168 = arith.addf %165, %167 : vector<1x32xf32>
    %169 = arith.index_cast %c9_i32 : i32 to index
    %c0_66 = arith.constant 0 : index
    %170 = vector.load %arg5[%169, %c0_66] : memref<16x32xf32, #tpu.memory_space<vmem>>, vector<1x32xf32>
    tpu.vector_store %arg5[%169, %c0_66], %168 {strides = array<i32>} : memref<16x32xf32, #tpu.memory_space<vmem>>, vector<1x32xf32>,
    %c10_i32 = arith.constant 10 : i32
    %171 = arith.addi %0, %c10_i32 : i32
    %172 = arith.index_cast %171 : i32 to index
    %173 = memref.load %arg1[%172] : memref<16xi32, #tpu.memory_space<smem>>
    %174 = arith.addi %0, %c10_i32 : i32
    %175 = arith.index_cast %174 : i32 to index
    %176 = memref.load %arg2[%175] : memref<16xi32, #tpu.memory_space<smem>>
    %c0_i32_67 = arith.constant 0 : i32
    %c31_i32_68 = arith.constant 31 : i32
    %177 = arith.maxsi %c0_i32_67, %173 : i32
    %178 = arith.minsi %c31_i32_68, %177 : i32
    %c0_i32_69 = arith.constant 0 : i32
    %c15_i32_70 = arith.constant 15 : i32
    %179 = arith.maxsi %c0_i32_69, %176 : i32
    %180 = arith.minsi %c15_i32_70, %179 : i32
    %181 = arith.index_cast %178 : i32 to index
    %c0_71 = arith.constant 0 : index
    %182 = vector.load %arg3[%181, %c0_71] : memref<32x32xf32, #tpu.memory_space<vmem>>, vector<1x32xf32>
    %183 = arith.index_cast %180 : i32 to index
    %c0_72 = arith.constant 0 : index
    %184 = vector.load %arg4[%183, %c0_72] : memref<16x32xf32, #tpu.memory_space<vmem>>, vector<1x32xf32>
    %185 = arith.addf %182, %184 : vector<1x32xf32>
    %186 = arith.index_cast %c10_i32 : i32 to index
    %c0_73 = arith.constant 0 : index
    %187 = vector.load %arg5[%186, %c0_73] : memref<16x32xf32, #tpu.memory_space<vmem>>, vector<1x32xf32>
    tpu.vector_store %arg5[%186, %c0_73], %185 {strides = array<i32>} : memref<16x32xf32, #tpu.memory_space<vmem>>, vector<1x32xf32>,
    %c11_i32 = arith.constant 11 : i32
    %188 = arith.addi %0, %c11_i32 : i32
    %189 = arith.index_cast %188 : i32 to index
    %190 = memref.load %arg1[%189] : memref<16xi32, #tpu.memory_space<smem>>
    %191 = arith.addi %0, %c11_i32 : i32
    %192 = arith.index_cast %191 : i32 to index
    %193 = memref.load %arg2[%192] : memref<16xi32, #tpu.memory_space<smem>>
    %c0_i32_74 = arith.constant 0 : i32
    %c31_i32_75 = arith.constant 31 : i32
    %194 = arith.maxsi %c0_i32_74, %190 : i32
    %195 = arith.minsi %c31_i32_75, %194 : i32
    %c0_i32_76 = arith.constant 0 : i32
    %c15_i32_77 = arith.constant 15 : i32
    %196 = arith.maxsi %c0_i32_76, %193 : i32
    %197 = arith.minsi %c15_i32_77, %196 : i32
    %198 = arith.index_cast %195 : i32 to index
    %c0_78 = arith.constant 0 : index
    %199 = vector.load %arg3[%198, %c0_78] : memref<32x32xf32, #tpu.memory_space<vmem>>, vector<1x32xf32>
    %200 = arith.index_cast %197 : i32 to index
    %c0_79 = arith.constant 0 : index
    %201 = vector.load %arg4[%200, %c0_79] : memref<16x32xf32, #tpu.memory_space<vmem>>, vector<1x32xf32>
    %202 = arith.addf %199, %201 : vector<1x32xf32>
    %203 = arith.index_cast %c11_i32 : i32 to index
    %c0_80 = arith.constant 0 : index
    %204 = vector.load %arg5[%203, %c0_80] : memref<16x32xf32, #tpu.memory_space<vmem>>, vector<1x32xf32>
    tpu.vector_store %arg5[%203, %c0_80], %202 {strides = array<i32>} : memref<16x32xf32, #tpu.memory_space<vmem>>, vector<1x32xf32>,
    %c12_i32 = arith.constant 12 : i32
    %205 = arith.addi %0, %c12_i32 : i32
    %206 = arith.index_cast %205 : i32 to index
    %207 = memref.load %arg1[%206] : memref<16xi32, #tpu.memory_space<smem>>
    %208 = arith.addi %0, %c12_i32 : i32
    %209 = arith.index_cast %208 : i32 to index
    %210 = memref.load %arg2[%209] : memref<16xi32, #tpu.memory_space<smem>>
    %c0_i32_81 = arith.constant 0 : i32
    %c31_i32_82 = arith.constant 31 : i32
    %211 = arith.maxsi %c0_i32_81, %207 : i32
    %212 = arith.minsi %c31_i32_82, %211 : i32
    %c0_i32_83 = arith.constant 0 : i32
    %c15_i32_84 = arith.constant 15 : i32
    %213 = arith.maxsi %c0_i32_83, %210 : i32
    %214 = arith.minsi %c15_i32_84, %213 : i32
    %215 = arith.index_cast %212 : i32 to index
    %c0_85 = arith.constant 0 : index
    %216 = vector.load %arg3[%215, %c0_85] : memref<32x32xf32, #tpu.memory_space<vmem>>, vector<1x32xf32>
    %217 = arith.index_cast %214 : i32 to index
    %c0_86 = arith.constant 0 : index
    %218 = vector.load %arg4[%217, %c0_86] : memref<16x32xf32, #tpu.memory_space<vmem>>, vector<1x32xf32>
    %219 = arith.addf %216, %218 : vector<1x32xf32>
    %220 = arith.index_cast %c12_i32 : i32 to index
    %c0_87 = arith.constant 0 : index
    %221 = vector.load %arg5[%220, %c0_87] : memref<16x32xf32, #tpu.memory_space<vmem>>, vector<1x32xf32>
    tpu.vector_store %arg5[%220, %c0_87], %219 {strides = array<i32>} : memref<16x32xf32, #tpu.memory_space<vmem>>, vector<1x32xf32>,
    %c13_i32 = arith.constant 13 : i32
    %222 = arith.addi %0, %c13_i32 : i32
    %223 = arith.index_cast %222 : i32 to index
    %224 = memref.load %arg1[%223] : memref<16xi32, #tpu.memory_space<smem>>
    %225 = arith.addi %0, %c13_i32 : i32
    %226 = arith.index_cast %225 : i32 to index
    %227 = memref.load %arg2[%226] : memref<16xi32, #tpu.memory_space<smem>>
    %c0_i32_88 = arith.constant 0 : i32
    %c31_i32_89 = arith.constant 31 : i32
    %228 = arith.maxsi %c0_i32_88, %224 : i32
    %229 = arith.minsi %c31_i32_89, %228 : i32
    %c0_i32_90 = arith.constant 0 : i32
    %c15_i32_91 = arith.constant 15 : i32
    %230 = arith.maxsi %c0_i32_90, %227 : i32
    %231 = arith.minsi %c15_i32_91, %230 : i32
    %232 = arith.index_cast %229 : i32 to index
    %c0_92 = arith.constant 0 : index
    %233 = vector.load %arg3[%232, %c0_92] : memref<32x32xf32, #tpu.memory_space<vmem>>, vector<1x32xf32>
    %234 = arith.index_cast %231 : i32 to index
    %c0_93 = arith.constant 0 : index
    %235 = vector.load %arg4[%234, %c0_93] : memref<16x32xf32, #tpu.memory_space<vmem>>, vector<1x32xf32>
    %236 = arith.addf %233, %235 : vector<1x32xf32>
    %237 = arith.index_cast %c13_i32 : i32 to index
    %c0_94 = arith.constant 0 : index
    %238 = vector.load %arg5[%237, %c0_94] : memref<16x32xf32, #tpu.memory_space<vmem>>, vector<1x32xf32>
    tpu.vector_store %arg5[%237, %c0_94], %236 {strides = array<i32>} : memref<16x32xf32, #tpu.memory_space<vmem>>, vector<1x32xf32>,
    %c14_i32 = arith.constant 14 : i32
    %239 = arith.addi %0, %c14_i32 : i32
    %240 = arith.index_cast %239 : i32 to index
    %241 = memref.load %arg1[%240] : memref<16xi32, #tpu.memory_space<smem>>
    %242 = arith.addi %0, %c14_i32 : i32
    %243 = arith.index_cast %242 : i32 to index
    %244 = memref.load %arg2[%243] : memref<16xi32, #tpu.memory_space<smem>>
    %c0_i32_95 = arith.constant 0 : i32
    %c31_i32_96 = arith.constant 31 : i32
    %245 = arith.maxsi %c0_i32_95, %241 : i32
    %246 = arith.minsi %c31_i32_96, %245 : i32
    %c0_i32_97 = arith.constant 0 : i32
    %c15_i32_98 = arith.constant 15 : i32
    %247 = arith.maxsi %c0_i32_97, %244 : i32
    %248 = arith.minsi %c15_i32_98, %247 : i32
    %249 = arith.index_cast %246 : i32 to index
    %c0_99 = arith.constant 0 : index
    %250 = vector.load %arg3[%249, %c0_99] : memref<32x32xf32, #tpu.memory_space<vmem>>, vector<1x32xf32>
    %251 = arith.index_cast %248 : i32 to index
    %c0_100 = arith.constant 0 : index
    %252 = vector.load %arg4[%251, %c0_100] : memref<16x32xf32, #tpu.memory_space<vmem>>, vector<1x32xf32>
    %253 = arith.addf %250, %252 : vector<1x32xf32>
    %254 = arith.index_cast %c14_i32 : i32 to index
    %c0_101 = arith.constant 0 : index
    %255 = vector.load %arg5[%254, %c0_101] : memref<16x32xf32, #tpu.memory_space<vmem>>, vector<1x32xf32>
    tpu.vector_store %arg5[%254, %c0_101], %253 {strides = array<i32>} : memref<16x32xf32, #tpu.memory_space<vmem>>, vector<1x32xf32>,
    %c15_i32_102 = arith.constant 15 : i32
    %256 = arith.addi %0, %c15_i32_102 : i32
    %257 = arith.index_cast %256 : i32 to index
    %258 = memref.load %arg1[%257] : memref<16xi32, #tpu.memory_space<smem>>
    %259 = arith.addi %0, %c15_i32_102 : i32
    %260 = arith.index_cast %259 : i32 to index
    %261 = memref.load %arg2[%260] : memref<16xi32, #tpu.memory_space<smem>>
    %c0_i32_103 = arith.constant 0 : i32
    %c31_i32_104 = arith.constant 31 : i32
    %262 = arith.maxsi %c0_i32_103, %258 : i32
    %263 = arith.minsi %c31_i32_104, %262 : i32
    %c0_i32_105 = arith.constant 0 : i32
    %c15_i32_106 = arith.constant 15 : i32
    %264 = arith.maxsi %c0_i32_105, %261 : i32
    %265 = arith.minsi %c15_i32_106, %264 : i32
    %266 = arith.index_cast %263 : i32 to index
    %c0_107 = arith.constant 0 : index
    %267 = vector.load %arg3[%266, %c0_107] : memref<32x32xf32, #tpu.memory_space<vmem>>, vector<1x32xf32>
    %268 = arith.index_cast %265 : i32 to index
    %c0_108 = arith.constant 0 : index
    %269 = vector.load %arg4[%268, %c0_108] : memref<16x32xf32, #tpu.memory_space<vmem>>, vector<1x32xf32>
    %270 = arith.addf %267, %269 : vector<1x32xf32>
    %271 = arith.index_cast %c15_i32_102 : i32 to index
    %c0_109 = arith.constant 0 : index
    %272 = vector.load %arg5[%271, %c0_109] : memref<16x32xf32, #tpu.memory_space<vmem>>, vector<1x32xf32>
    tpu.vector_store %arg5[%271, %c0_109], %270 {strides = array<i32>} : memref<16x32xf32, #tpu.memory_space<vmem>>, vector<1x32xf32>,
    %c16_i32_110 = arith.constant 16 : i32
    return
  }
  func.func @transform_0(%arg0: i32, %arg1: memref<16xi32, #tpu.memory_space<smem>>, %arg2: memref<16xi32, #tpu.memory_space<smem>>) -> (i32, i32) {
    %c0_i32 = arith.constant 0 : i32
    %c0_i32_0 = arith.constant 0 : i32
    %c0_i32_1 = arith.constant 0 : i32
    return %c0_i32, %c0_i32_0 : i32, i32
  }
  func.func @transform_1(%arg0: i32, %arg1: memref<16xi32, #tpu.memory_space<smem>>, %arg2: memref<16xi32, #tpu.memory_space<smem>>) -> (i32, i32) {
    %c0_i32 = arith.constant 0 : i32
    %c0_i32_0 = arith.constant 0 : i32
    %c0_i32_1 = arith.constant 0 : i32
    return %c0_i32, %c0_i32_0 : i32, i32
  }
  func.func @transform_2(%arg0: i32, %arg1: memref<16xi32, #tpu.memory_space<smem>>, %arg2: memref<16xi32, #tpu.memory_space<smem>>) -> (i32, i32) {
    %c0_i32 = arith.constant 0 : i32
    %c0_i32_0 = arith.constant 0 : i32
    return %arg0, %c0_i32 : i32, i32
  }
}

</mosaic_0001>

<bundles_post_ra>
// kernel: tpu_custom_call.1
= control target key start
LH: loop header
LB: loop body
LE: loop exit
PB: predicated region body
PF: predicated region fallthrough
CT: control target
= control target key end

     0   :  { %s968_s0 = inlined_call_operand.hbm [shape: s32[16], index: 0, kind: input, shape index: {}]   ;;  %s969_s2 = inlined_call_operand.hbm [shape: f32[32,32], index: 2, kind: input, shape index: {}]   ;;  %s970_s3 = inlined_call_operand.hbm [shape: f32[16,32], index: 3, kind: input, shape index: {}]   ;;  %s971_s4 = inlined_call_operand.hbm [shape: f32[16,32], index: 4, kind: output, shape index: {}]   ;;  %s972_s1 = inlined_call_operand.vmem [shape: s32[16], index: 1, kind: input, shape index: {}]  }
   0x1   :  { %s634_s17 = scalar_lea.hbm %s968_s0, 16 }
   0x2   :  { %p635_p0 = scmp.ne.s32.totalorder %s968_s0, %s634_s17  ;;  %p638_p1 = scmp.lt.u32.totalorder %s634_s17, %s968_s0 }
   0x4   :  { %p640_p2 = pnand %p638_p1, %p635_p0 }
   0x6   :  { %643 = shalt.err (!%p640_p2)  }
   0x7   :  { %s730_s22 = smov [#allocation3]   ;;  %s11_s27 = sshll.u32 %s972_s1, 4  ;;  %s12_s27 = int_to_ptr.vmem [resolvable:$true] %s11_s27 }
   0x8   :  { %10 = dma.hbm_to_smem %s968_s0, 16, %s730_s22, [#allocation2] }
   0x9   :  { %s644_s28 = scalar_lea.vmem %s12_s27, 16  ;;  %p649_p4 = scmp.lt.s32.totalorder %s12_s27, %s12_s27 }
   0xa   :  { %p645_p3 = scmp.ne.s32.totalorder %s12_s27, %s644_s28  ;;  %p650_p5 = scmp.lt.s32.totalorder %s644_s28, %s644_s28 }
   0xc   :  { %p651_p6 = por %p650_p5, %p649_p4 }
   0xe   :  { %p652_p7 = pnand %p651_p6, %p645_p3 }
  0x10   :  { %655 = shalt.err (!%p652_p7)  }
  0x11   :  { %s731_s29 = smov [#allocation4]  }
  0x12   :  { %14 = dma.vmem_to_smem %s12_s27, 16, %s731_s29, [#allocation2] }
  0x13   :  { %722 = dma.done.wait [#allocation2], 32 }
  0x14   :  { %723 = vsyncadd [#allocation2], 4294967264 }
  0x15   :  { %16 = sfence }
  0x16   :  { %17 = vsyncpa [#allocation6], 0 }
  0x17   :  { %18 = vsyncpa [#allocation9], 0 }
  0x18   :  { %19 = vsyncpa [#allocation7], 0  ;;  %s732_s0 = smov [#allocation5]   ;;  %s656_s6 = scalar_lea.hbm %s969_s2, 512 }
  0x19   :  { %s25_s30 = sshll.u32 %s732_s0, 4  ;;  %p657_p8 = scmp.ne.s32.totalorder %s969_s2, %s656_s6  ;;  %s26_s30 = int_to_ptr.vmem [resolvable:$true] %s25_s30 }
  0x1a   :  { %p660_p9 = scmp.lt.u32.totalorder %s656_s6, %s969_s2 }
  0x1c   :  { %p662_p10 = pnand %p660_p9, %p657_p8 }
  0x1e   :  { %665 = shalt.err (!%p662_p10)
}
  0x1f   :  { %s666_s11 = scalar_lea.vmem %s26_s30, 512  ;;  %p671_p12 = scmp.lt.s32.totalorder %s26_s30, %s26_s30 }
  0x20   :  { %p667_p11 = scmp.ne.s32.totalorder %s26_s30, %s666_s11  ;;  %p672_p13 = scmp.lt.s32.totalorder %s666_s11, %s666_s11 }
  0x22   :  { %p673_p0 = por %p672_p13, %p671_p12 }
  0x24   :  { %p674_p1 = pnand %p673_p0, %p667_p11 }
  0x26   :  { %677 = shalt.err (!%p674_p1)
}
  0x27   :  { %s733_s12 = smov 128   ;;  %s734_s13 = smov 8  }
  0x28   :  { %31 = dma.hbm_to_vmem [thread:$0]  %s969_s2, 512, %s26_s30, [#allocation6], %s733_s12, %s733_s12, %s734_s13  }
  0x29   :  { %s735_s16 = smov [#allocation8]   ;;  %s678_s20 = scalar_lea.hbm %s970_s3, 256 }
  0x2a   :  { %s37_s17 = sshll.u32 %s735_s16, 4  ;;  %p679_p2 = scmp.ne.s32.totalorder %s970_s3, %s678_s20  ;;  %s38_s17 = int_to_ptr.vmem [resolvable:$true] %s37_s17 }
  0x2b   :  { %p682_p3 = scmp.lt.u32.totalorder %s678_s20, %s970_s3 }
  0x2d   :  { %p684_p4 = pnand %p682_p3, %p679_p2 }
  0x2f   :  { %687 = shalt.err (!%p684_p4)
}
  0x30   :  { %s688_s25 = scalar_lea.vmem %s38_s17, 256  ;;  %p693_p6 = scmp.lt.s32.totalorder %s38_s17, %s38_s17 }
  0x31   :  { %p689_p5 = scmp.ne.s32.totalorder %s38_s17, %s688_s25  ;;  %p694_p7 = scmp.lt.s32.totalorder %s688_s25, %s688_s25 }
  0x33   :  { %p695_p8 = por %p694_p7, %p693_p6 }
  0x35   :  { %p696_p9 = pnand %p695_p8, %p689_p5 }
  0x37   :  { %699 = shalt.err (!%p696_p9)
}
  0x38   :  { %43 = dma.hbm_to_vmem [thread:$0]  %s970_s3, 256, %s38_s17, [#allocation9], %s733_s12, %s733_s12, %s734_s13  }
  0x39   :  { %724 = dma.done.wait [#allocation6], 512  }
  0x3a   :  { %725 = vsyncadd [#allocation6], 4294966784 }
  0x3b   :  { %726 = dma.done.wait [#allocation9], 256  }
  0x3c   :  { %727 = vsyncadd [#allocation9], 4294967040  ;;  %s51_s27 = sld [smem:[#allocation3]]  ;;  %s807_s29 = sld [smem:[#allocation3 + $0x1]]  ;;  %vm66_vm0 = vcmask 253952  }
  0x3d   :  { %s52_s28 = sld [smem:[#allocation4]]  ;;  %s809_s0 = sld [smem:[#allocation4 + $0x1]] }
  0x3e   :  { %s811_s30 = sld [smem:[#allocation3 + $0x2]]  ;;  %s815_s5 = sld [smem:[#allocation3 + $0x3]] }
  0x3f   :  { %s813_s1 = sld [smem:[#allocation4 + $0x2]]  ;;  %s817_s6 = sld [smem:[#allocation4 + $0x3]] }
  0x40   :  { %s819_s3 = sld [smem:[#allocation3 + $0x4]]  ;;  %s823_s8 = sld [smem:[#allocation3 + $0x5]] }
  0x41   :  { %s821_s7 = sld [smem:[#allocation4 + $0x4]]  ;;  %s825_s9 = sld [smem:[#allocation4 + $0x5]] }
  0x42   :  { %p53_p10 = scmp.gt.s32.totalorder %s51_s27, 0  ;;  %p373_p11 = scmp.lt.s32.totalorder %s51_s27, 31 }
  0x43   :  { %p57_p12 = scmp.gt.s32.totalorder %s52_s28, 0  ;;  %p378_p13 = scmp.lt.s32.totalorder %s52_s28, 15 }
  0x44   :  { %s974_s27 = smov (!%p53_p10, %s51_s27), 0  ;;  %p71_p0 = scmp.gt.s32.totalorder %s807_s29, 0 }
  0x45   :  { %s976_s28 = smov (!%p57_p12, %s52_s28), 0  ;;  %s978_s27 = smov (!%p373_p11, %s974_s27), 31 }
  0x46   :  { %s980_s28 = smov (!%p378_p13, %s976_s28), 15  ;;  %s61_s10 = scalar_lea.vmem [#allocation5], %s978_s27 }
  0x47   :  { %v62_v0 = vld [vmem:[%s61_s10] sm:$0x1]  ;;  %p385_p1 = scmp.lt.s32.totalorder %s807_s29, 31  ;;  %s63_s11 = scalar_lea.vmem [#allocation8], %s980_s28 }
  0x48   :  { %v64_v1 = vld [vmem:[%s63_s11] sm:$0x1]  ;;  %s982_s29 = smov (!%p71_p0, %s807_s29), 0  ;;  %p75_p2 = scmp.gt.s32.totalorder %s809_s0, 0 }
  0x49   :  { %v65_v2 = vadd.f32 %v64_v1, %v62_v0  ;;  %p390_p3 = scmp.lt.s32.totalorder %s809_s0, 15  ;;  %s984_s29 = smov (!%p385_p1, %s982_s29), 31 }
  0x4a   :  { %s986_s0 = smov (!%p75_p2, %s809_s0), 0  ;;  %p88_p4 = scmp.gt.s32.totalorder %s811_s30, 0 }
  0x4b   :  { %67 = vst.msk [vmem:[#allocation10] sm:$0x1] %vm66_vm0, %v65_v2  ;;  %s988_s0 = smov (!%p390_p3, %s986_s0), 15  ;;  %s79_s14 = scalar_lea.vmem [#allocation5], %s984_s29 }
  0x4c   :  { %v80_v3 = vld [vmem:[%s79_s14] sm:$0x1]  ;;  %s89_s15 = scalar_select %p88_p4, %s811_s30, 0 }
  0x4d   :  { %p397_p5 = scmp.lt.s32.totalorder %s811_s30, 31  ;;  %s81_s16 = scalar_lea.vmem [#allocation8], %s988_s0 }
  0x4e   :  { %v82_v4 = vld [vmem:[%s81_s16] sm:$0x1]  ;;  %p92_p6 = scmp.gt.s32.totalorder %s813_s1, 0  ;;  %p402_p7 = scmp.lt.s32.totalorder %s813_s1, 15 }
  0x4f   :  { %v83_v5 = vadd.f32 %v82_v4, %v80_v3  ;;  %s990_s15 = smov (!%p397_p5, %s89_s15), 31  ;;  %p105_p8 = scmp.gt.s32.totalorder %s815_s5, 0 }
  0x50   :  { %s992_s1 = smov (!%p92_p6, %s813_s1), 0  ;;  %s96_s17 = scalar_lea.vmem [#allocation5], %s990_s15 }
  0x51   :  { %84 = vst.msk [vmem:[#allocation10 + $0x1] sm:$0x1] %vm66_vm0, %v83_v5  ;;  %s994_s1 = smov (!%p402_p7, %s992_s1), 15  ;;  %v97_v6 = vld [vmem:[%s96_s17] sm:$0x1]  ;;  %p409_p9 = scmp.lt.s32.totalorder %s815_s5, 31 }
  0x52   :  { %s106_s18 = scalar_select %p105_p8, %s815_s5, 0 }
  0x53   :  { %s98_s19 = scalar_lea.vmem [#allocation8], %s994_s1  ;;  %p109_p10 = scmp.gt.s32.totalorder %s817_s6, 0 }
  0x54   :  { %v99_v7 = vld [vmem:[%s98_s19] sm:$0x1]  ;;  %p414_p11 = scmp.lt.s32.totalorder %s817_s6, 15  ;;  %s996_s18 = smov (!%p409_p9, %s106_s18), 31 }
  0x55   :  { %v100_v8 = vadd.f32 %v99_v7, %v97_v6  ;;  %s998_s6 = smov (!%p109_p10, %s817_s6), 0  ;;  %p122_p12 = scmp.gt.s32.totalorder %s819_s3, 0 }
  0x56   :  { %s1000_s6 = smov (!%p414_p11, %s998_s6), 15  ;;  %s113_s20 = scalar_lea.vmem [#allocation5], %s996_s18 }
  0x57   :  { %101 = vst.msk [vmem:[#allocation10 + $0x2] sm:$0x1] %vm66_vm0, %v100_v8  ;;  %v114_v9 = vld [vmem:[%s113_s20] sm:$0x1]  ;;  %s123_s21 = scalar_select %p122_p12, %s819_s3, 0 }
  0x58   :  { %p421_p13 = scmp.lt.s32.totalorder %s819_s3, 31  ;;  %s115_s22 = scalar_lea.vmem [#allocation8], %s1000_s6 }
  0x59   :  { %v116_v10 = vld [vmem:[%s115_s22] sm:$0x1]  ;;  %p126_p0 = scmp.gt.s32.totalorder %s821_s7, 0  ;;  %p426_p1 = scmp.lt.s32.totalorder %s821_s7, 15 }
  0x5a   :  { %v117_v11 = vadd.f32 %v116_v10, %v114_v9  ;;  %s1002_s21 = smov (!%p421_p13, %s123_s21), 31  ;;  %p139_p2 = scmp.gt.s32.totalorder %s823_s8, 0 }
  0x5b   :  { %s1004_s7 = smov (!%p126_p0, %s821_s7), 0  ;;  %s130_s23 = scalar_lea.vmem [#allocation5], %s1002_s21 }
  0x5c   :  { %118 = vst.msk [vmem:[#allocation10 + $0x3] sm:$0x1] %vm66_vm0, %v117_v11  ;;  %s1006_s7 = smov (!%p426_p1, %s1004_s7), 15  ;;  %v131_v12 = vld [vmem:[%s130_s23] sm:$0x1]  ;;  %p433_p3 = scmp.lt.s32.totalorder %s823_s8, 31 }
  0x5d   :  { %s140_s24 = scalar_select %p139_p2, %s823_s8, 0 }
  0x5e   :  { %s132_s25 = scalar_lea.vmem [#allocation8], %s1006_s7  ;;  %p143_p4 = scmp.gt.s32.totalorder %s825_s9, 0 }
  0x5f   :  { %v133_v13 = vld [vmem:[%s132_s25] sm:$0x1]  ;;  %p438_p5 = scmp.lt.s32.totalorder %s825_s9, 15  ;;  %s1008_s24 = smov (!%p433_p3, %s140_s24), 31 }
  0x60   :  { %v134_v14 = vadd.f32 %v133_v13, %v131_v12  ;;  %s1010_s9 = smov (!%p143_p4, %s825_s9), 0  ;;  %s443_s2 = sld [smem:[#allocation3 + $0x6]] }
  0x61   :  { %s1012_s9 = smov (!%p438_p5, %s1010_s9), 15  ;;  %s147_s26 = scalar_lea.vmem [#allocation5], %s1008_s24 }
  0x62   :  { %135 = vst.msk [vmem:[#allocation10 + $0x4] sm:$0x1] %vm66_vm0, %v134_v14  ;;  %v148_v15 = vld [vmem:[%s147_s26] sm:$0x1]  ;;  %s444_s27 = sld [smem:[#allocation4 + $0x6]]  ;;  %s862_s28 = sld [smem:[#allocation3 + $0x7]] }
  0x63   :  { %s864_s29 = sld [smem:[#allocation4 + $0x7]]  ;;  %s149_s0 = scalar_lea.vmem [#allocation8], %s1012_s9 }
  0x64   :  { %v150_v16 = vld [vmem:[%s149_s0] sm:$0x1]  ;;  %s866_s30 = sld [smem:[#allocation3 + $0x8]]  ;;  %s870_s5 = sld [smem:[#allocation3 + $0x9]] }
  0x65   :  { %s868_s1 = sld [smem:[#allocation4 + $0x8]]  ;;  %v151_v17 = vadd.f32 %v150_v16, %v148_v15  ;;  %s872_s6 = sld [smem:[#allocation4 + $0x9]] }
  0x66   :  { %p156_p6 = scmp.gt.s32.totalorder %s443_s2, 0  ;;  %p445_p7 = scmp.lt.s32.totalorder %s443_s2, 31 }
  0x67   :  { %152 = vst.msk [vmem:[#allocation10 + $0x5] sm:$0x1] %vm66_vm0, %v151_v17  ;;  %s875_s3 = sld [smem:[#allocation3 + $0xa]]  ;;  %s503_s22 = sld [smem:[#allocation3 + $0xb]] }
  0x68   :  { %s877_s7 = sld [smem:[#allocation4 + $0xa]]  ;;  %s1014_s2 = smov (!%p156_p6, %s443_s2), 0 }
  0x69   :  { %p160_p8 = scmp.gt.s32.totalorder %s444_s27, 0  ;;  %p450_p9 = scmp.lt.s32.totalorder %s444_s27, 15 }
  0x6a   :  { %s1016_s2 = smov (!%p445_p7, %s1014_s2), 31  ;;  %p173_p10 = scmp.gt.s32.totalorder %s862_s28, 0 }
  0x6b   :  { %s1018_s27 = smov (!%p160_p8, %s444_s27), 0  ;;  %s164_s8 = scalar_lea.vmem [#allocation5], %s1016_s2 }
  0x6c   :  { %s1020_s27 = smov (!%p450_p9, %s1018_s27), 15  ;;  %v165_v18 = vld [vmem:[%s164_s8] sm:$0x1]  ;;  %p457_p11 = scmp.lt.s32.totalorder %s862_s28, 31 }
  0x6d   :  { %s174_s9 = scalar_select %p173_p10, %s862_s28, 0 }
  0x6e   :  { %s166_s10 = scalar_lea.vmem [#allocation8], %s1020_s27  ;;  %p177_p12 = scmp.gt.s32.totalorder %s864_s29, 0 }
  0x6f   :  { %v167_v19 = vld [vmem:[%s166_s10] sm:$0x1]  ;;  %p462_p13 = scmp.lt.s32.totalorder %s864_s29, 15  ;;  %s1022_s9 = smov (!%p457_p11, %s174_s9), 31 }
  0x70   :  { %v168_v20 = vadd.f32 %v167_v19, %v165_v18  ;;  %s1024_s29 = smov (!%p177_p12, %s864_s29), 0  ;;  %p190_p0 = scmp.gt.s32.totalorder %s866_s30, 0 }
  0x71   :  { %s1026_s29 = smov (!%p462_p13, %s1024_s29), 15  ;;  %s181_s11 = scalar_lea.vmem [#allocation5], %s1022_s9 }
  0x72   :  { %169 = vst.msk [vmem:[#allocation10 + $0x6] sm:$0x1] %vm66_vm0, %v168_v20  ;;  %v182_v21 = vld [vmem:[%s181_s11] sm:$0x1]  ;;  %s191_s14 = scalar_select %p190_p0, %s866_s30, 0 }
  0x73   :  { %p469_p1 = scmp.lt.s32.totalorder %s866_s30, 31  ;;  %s183_s15 = scalar_lea.vmem [#allocation8], %s1026_s29 }
  0x74   :  { %v184_v22 = vld [vmem:[%s183_s15] sm:$0x1]  ;;  %p194_p2 = scmp.gt.s32.totalorder %s868_s1, 0  ;;  %p474_p3 = scmp.lt.s32.totalorder %s868_s1, 15 }
  0x75   :  { %v185_v23 = vadd.f32 %v184_v22, %v182_v21  ;;  %s1028_s14 = smov (!%p469_p1, %s191_s14), 31  ;;  %p207_p4 = scmp.gt.s32.totalorder %s870_s5, 0 }
  0x76   :  { %s1030_s1 = smov (!%p194_p2, %s868_s1), 0  ;;  %s198_s16 = scalar_lea.vmem [#allocation5], %s1028_s14 }
  0x77   :  { %186 = vst.msk [vmem:[#allocation10 + $0x7] sm:$0x1] %vm66_vm0, %v185_v23  ;;  %s1032_s1 = smov (!%p474_p3, %s1030_s1), 15  ;;  %v199_v24 = vld [vmem:[%s198_s16] sm:$0x1]  ;;  %p481_p5 = scmp.lt.s32.totalorder %s870_s5, 31 }
  0x78   :  { %s208_s17 = scalar_select %p207_p4, %s870_s5, 0 }
  0x79   :  { %s200_s18 = scalar_lea.vmem [#allocation8], %s1032_s1  ;;  %p211_p6 = scmp.gt.s32.totalorder %s872_s6, 0 }
  0x7a   :  { %v201_v25 = vld [vmem:[%s200_s18] sm:$0x1]  ;;  %p486_p7 = scmp.lt.s32.totalorder %s872_s6, 15  ;;  %s1034_s17 = smov (!%p481_p5, %s208_s17), 31 }
  0x7b   :  { %v202_v26 = vadd.f32 %v201_v25, %v199_v24  ;;  %s1036_s6 = smov (!%p211_p6, %s872_s6), 0  ;;  %p224_p8 = scmp.gt.s32.totalorder %s875_s3, 0 }
  0x7c   :  { %s1038_s6 = smov (!%p486_p7, %s1036_s6), 15  ;;  %s215_s19 = scalar_lea.vmem [#allocation5], %s1034_s17 }
  0x7d   :  { %203 = vst.msk [vmem:[#allocation10 + $0x8] sm:$0x1] %vm66_vm0, %v202_v26  ;;  %v216_v27 = vld [vmem:[%s215_s19] sm:$0x1]  ;;  %s225_s20 = scalar_select %p224_p8, %s875_s3, 0 }
  0x7e   :  { %p493_p9 = scmp.lt.s32.totalorder %s875_s3, 31  ;;  %s217_s21 = scalar_lea.vmem [#allocation8], %s1038_s6 }
  0x7f   :  { %v218_v28 = vld [vmem:[%s217_s21] sm:$0x1]  ;;  %p228_p10 = scmp.gt.s32.totalorder %s877_s7, 0  ;;  %p498_p11 = scmp.lt.s32.totalorder %s877_s7, 15 }
  0x80   :  { %v219_v29 = vadd.f32 %v218_v28, %v216_v27  ;;  %s1040_s20 = smov (!%p493_p9, %s225_s20), 31  ;;  %s504_s24 = sld [smem:[#allocation4 + $0xb]] }
  0x81   :  { %s1042_s7 = smov (!%p228_p10, %s877_s7), 0  ;;  %s232_s23 = scalar_lea.vmem [#allocation5], %s1040_s20 }
  0x82   :  { %220 = vst.msk [vmem:[#allocation10 + $0x9] sm:$0x1] %vm66_vm0, %v219_v29  ;;  %s1044_s7 = smov (!%p498_p11, %s1042_s7), 15  ;;  %v233_v30 = vld [vmem:[%s232_s23] sm:$0x1]  ;;  %s907_s25 = sld [smem:[#allocation3 + $0xc]] }
  0x83   :  { %s909_s2 = sld [smem:[#allocation4 + $0xc]]  ;;  %s234_s26 = scalar_lea.vmem [#allocation8], %s1044_s7 }
  0x84   :  { %v235_v31 = vld [vmem:[%s234_s26] sm:$0x1]  ;;  %s911_s27 = sld [smem:[#allocation3 + $0xd]]  ;;  %s915_s29 = sld [smem:[#allocation3 + $0xe]] }
  0x85   :  { %s913_s28 = sld [smem:[#allocation4 + $0xd]]  ;;  %v236_v32 = vadd.f32 %v235_v31, %v233_v30  ;;  %s917_s0 = sld [smem:[#allocation4 + $0xe]] }
  0x86   :  { %p241_p12 = scmp.gt.s32.totalorder %s503_s22, 0  ;;  %p505_p13 = scmp.lt.s32.totalorder %s503_s22, 31 }
  0x87   :  { %237 = vst.msk [vmem:[#allocation10 + $0xa] sm:$0x1] %vm66_vm0, %v236_v32  ;;  %s920_s30 = sld [smem:[#allocation3 + $0xf]]  ;;  %p245_p0 = scmp.gt.s32.totalorder %s504_s24, 0 }
  0x88   :  { %s922_s1 = sld [smem:[#allocation4 + $0xf]]  ;;  %s1046_s22 = smov (!%p241_p12, %s503_s22), 0 }
  0x89   :  { %p510_p1 = scmp.lt.s32.totalorder %s504_s24, 15  ;;  %s1048_s22 = smov (!%p505_p13, %s1046_s22), 31 }
  0x8a   :  { %s1050_s24 = smov (!%p245_p0, %s504_s24), 0  ;;  %p258_p2 = scmp.gt.s32.totalorder %s907_s25, 0 }
  0x8b   :  { %s1052_s24 = smov (!%p510_p1, %s1050_s24), 15  ;;  %s249_s5 = scalar_lea.vmem [#allocation5], %s1048_s22 }
  0x8c   :  { %v250_v33 = vld [vmem:[%s249_s5] sm:$0x1]  ;;  %s259_s6 = scalar_select %p258_p2, %s907_s25, 0 }
  0x8d   :  { %p517_p3 = scmp.lt.s32.totalorder %s907_s25, 31  ;;  %s251_s3 = scalar_lea.vmem [#allocation8], %s1052_s24 }
  0x8e   :  { %v252_v34 = vld [vmem:[%s251_s3] sm:$0x1]  ;;  %p262_p4 = scmp.gt.s32.totalorder %s909_s2, 0  ;;  %p522_p5 = scmp.lt.s32.totalorder %s909_s2, 15 }
  0x8f   :  { %v253_v35 = vadd.f32 %v252_v34, %v250_v33  ;;  %s1054_s6 = smov (!%p517_p3, %s259_s6), 31  ;;  %p275_p6 = scmp.gt.s32.totalorder %s911_s27, 0 }
  0x90   :  { %s1056_s2 = smov (!%p262_p4, %s909_s2), 0  ;;  %s266_s7 = scalar_lea.vmem [#allocation5], %s1054_s6 }
  0x91   :  { %254 = vst.msk [vmem:[#allocation10 + $0xb] sm:$0x1] %vm66_vm0, %v253_v35  ;;  %s1058_s2 = smov (!%p522_p5, %s1056_s2), 15  ;;  %v267_v36 = vld [vmem:[%s266_s7] sm:$0x1]  ;;  %p529_p7 = scmp.lt.s32.totalorder %s911_s27, 31 }
  0x92   :  { %s276_s8 = scalar_select %p275_p6, %s911_s27, 0 }
  0x93   :  { %s268_s9 = scalar_lea.vmem [#allocation8], %s1058_s2  ;;  %p279_p8 = scmp.gt.s32.totalorder %s913_s28, 0 }
  0x94   :  { %v269_v37 = vld [vmem:[%s268_s9] sm:$0x1]  ;;  %p534_p9 = scmp.lt.s32.totalorder %s913_s28, 15  ;;  %s1060_s8 = smov (!%p529_p7, %s276_s8), 31 }
  0x95   :  { %v270_v38 = vadd.f32 %v269_v37, %v267_v36  ;;  %s1062_s28 = smov (!%p279_p8, %s913_s28), 0  ;;  %p292_p10 = scmp.gt.s32.totalorder %s915_s29, 0 }
  0x96   :  { %s1064_s28 = smov (!%p534_p9, %s1062_s28), 15  ;;  %s283_s10 = scalar_lea.vmem [#allocation5], %s1060_s8 }
  0x97   :  { %271 = vst.msk [vmem:[#allocation10 + $0xc] sm:$0x1] %vm66_vm0, %v270_v38  ;;  %v284_v39 = vld [vmem:[%s283_s10] sm:$0x1]  ;;  %s293_s11 = scalar_select %p292_p10, %s915_s29, 0 }
  0x98   :  { %p541_p11 = scmp.lt.s32.totalorder %s915_s29, 31  ;;  %s285_s14 = scalar_lea.vmem [#allocation8], %s1064_s28 }
  0x99   :  { %v286_v40 = vld [vmem:[%s285_s14] sm:$0x1]  ;;  %p296_p12 = scmp.gt.s32.totalorder %s917_s0, 0  ;;  %p546_p13 = scmp.lt.s32.totalorder %s917_s0, 15 }
  0x9a   :  { %v287_v41 = vadd.f32 %v286_v40, %v284_v39  ;;  %s1066_s11 = smov (!%p541_p11, %s293_s11), 31  ;;  %p309_p0 = scmp.gt.s32.totalorder %s920_s30, 0 }
  0x9b   :  { %s1068_s0 = smov (!%p296_p12, %s917_s0), 0  ;;  %s300_s15 = scalar_lea.vmem [#allocation5], %s1066_s11 }
  0x9c   :  { %288 = vst.msk [vmem:[#allocation10 + $0xd] sm:$0x1] %vm66_vm0, %v287_v41  ;;  %s1070_s0 = smov (!%p546_p13, %s1068_s0), 15  ;;  %v301_v42 = vld [vmem:[%s300_s15] sm:$0x1]  ;;  %p553_p1 = scmp.lt.s32.totalorder %s920_s30, 31 }
  0x9d   :  { %s310_s16 = scalar_select %p309_p0, %s920_s30, 0 }
  0x9e   :  { %s302_s17 = scalar_lea.vmem [#allocation8], %s1070_s0  ;;  %p313_p2 = scmp.gt.s32.totalorder %s922_s1, 0 }
  0x9f   :  { %v303_v43 = vld [vmem:[%s302_s17] sm:$0x1]  ;;  %p558_p3 = scmp.lt.s32.totalorder %s922_s1, 15  ;;  %s1072_s16 = smov (!%p553_p1, %s310_s16), 31 }
  0xa0   :  { %v304_v44 = vadd.f32 %v303_v43, %v301_v42  ;;  %s1074_s1 = smov (!%p313_p2, %s922_s1), 0  ;;  %s317_s18 = scalar_lea.vmem [#allocation5], %s1072_s16 }
  0xa1   :  { %s1076_s1 = smov (!%p558_p3, %s1074_s1), 15  ;;  %v318_v45 = vld [vmem:[%s317_s18] sm:$0x1]  ;;  %s736_s19 = smov [#allocation10]  }
  0xa2   :  { %305 = vst.msk [vmem:[#allocation10 + $0xe] sm:$0x1] %vm66_vm0, %v304_v44  ;;  %s328_s20 = sshll.u32 %s736_s19, 4  ;;  %s319_s21 = scalar_lea.vmem [#allocation8], %s1076_s1  ;;  %s329_s20 = int_to_ptr.vmem [resolvable:$true] %s328_s20 }
  0xa3   :  { %v320_v46 = vld [vmem:[%s319_s21] sm:$0x1]  ;;  %s700_s22 = scalar_lea.vmem %s329_s20, 256  ;;  %p705_p5 = scmp.lt.s32.totalorder %s329_s20, %s329_s20 }
  0xa4   :  { %v321_v47 = vadd.f32 %v320_v46, %v318_v45  ;;  %p701_p4 = scmp.ne.s32.totalorder %s329_s20, %s700_s22  ;;  %p706_p6 = scmp.lt.s32.totalorder %s700_s22, %s700_s22 }
  0xa6   :  { %322 = vst.msk [vmem:[#allocation10 + $0xf] sm:$0x1] %vm66_vm0, %v321_v47  ;;  %p707_p7 = por %p706_p6, %p705_p5 }
  0xa8   :  { %p708_p8 = pnand %p707_p7, %p701_p4 }
  0xaa   :  { %711 = shalt.err (!%p708_p8)
}
  0xab   :  { %s712_s25 = scalar_lea.hbm %s971_s4, 256 }
  0xac   :  { %p713_p9 = scmp.ne.s32.totalorder %s971_s4, %s712_s25  ;;  %p716_p10 = scmp.lt.u32.totalorder %s712_s25, %s971_s4 }
  0xae   :  { %p718_p11 = pnand %p716_p10, %p713_p9 }
  0xb0   :  { %721 = shalt.err (!%p718_p11)
}
  0xb1   :  { %334 = dma.vmem_to_hbm [thread:$0]  %s329_s20, 256, %s971_s4, [#allocation7], %s733_s12, %s733_s12, %s734_s13  }
  0xb2   :  { %728 = dma.done.wait [#allocation7], 256  }
  0xb3   :  { %729 = vsyncadd [#allocation7], 4294967040 }
  0xb4   :  { %338 = vsyncpa [#allocation6], 1 }
  0xb5   :  { %339 = vsyncpa [#allocation9], 1 }
  0xb6   :  { %340 = vsyncpa [#allocation7], 1 }

</bundles_post_ra>
